<compile_context>
chip_gen: v6e
topology: v6e:2x2x1
jax: 0.10.0
libtpu: 0.0.40
codegen_flags: <defaults>
</compile_context>

<pallas_src>
import functools
import numpy as np
import jax
import jax.numpy as jnp
from jax.experimental import pallas as pl
from jax.experimental.pallas import tpu as pltpu


# ----------------------------------------------------------------------------
# helpers
# ----------------------------------------------------------------------------
def _round_up(x, m):
    return ((x + m - 1) // m) * m


def _pick_tile(dim, candidates):
    """Largest candidate that divides dim; else the full dim (single block)."""
    for c in candidates:
        if dim >= c and dim % c == 0:
            return c
    return dim


ROW_ALIGN = 16                          # bf16 sublane packing minimum
TILE_M_CANDS = (256, 128, 64, 32, 16, 8)
TILE_N_CANDS = (512, 256, 128)
TILE_K_CANDS = (512, 256, 128)


# ----------------------------------------------------------------------------
# Pallas kernel: tiled y = x @ wt + b, bias-initialized accumulator,
# optional fused ELU.  Accumulates directly into o_ref when it is f32;
# uses an f32 VMEM scratch only when the output dtype is narrower (bf16).
# ----------------------------------------------------------------------------
def _linear_kernel(x_ref, wt_ref, b_ref, o_ref, *acc_refs, activation):
    acc_ref = acc_refs[0] if acc_refs else o_ref     # f32 accumulate target
    k = pl.program_id(2)

    @pl.when(k == 0)
    def _():
        # Bias add folded into the accumulator init (no epilogue VPU add).
        acc_ref[...] = jnp.broadcast_to(b_ref[...], acc_ref.shape)

    acc_ref[...] += jnp.dot(x_ref[...], wt_ref[...],
                            preferred_element_type=jnp.float32)

    if acc_refs or activation is not None:
        @pl.when(k == pl.num_programs(2) - 1)
        def _():
            r = acc_ref[...]
            if activation == "elu":
                # expm1 on the clamped negative branch: accurate near 0, no inf.
                r = jnp.where(r > 0, r, jnp.expm1(jnp.minimum(r, 0.0)))
            o_ref[...] = r.astype(o_ref.dtype)


def linear_padded(x_pad, lin, *, activation=None, out_dtype=jnp.float32):
    """nn.Linear on pre-padded operands.

    x_pad : (Mp, Kp) bf16, already padded/laid out (Mp mult of 16/8, Kp = lin K pad).
    lin   : dict from pack_linear -> wt (Kp, Np) bf16, b (1, Np) f32, tile_k.
    Returns the FULL padded (Mp, Np) output (no slicing) in out_dtype so it can
    feed the next pallas_call directly.
    """
    wt, b_pad, tile_k = lin["wt"], lin["b"], lin["tile_k"]
    Kp, Np = wt.shape
    Mp, Kx = x_pad.shape
    assert Kx == Kp, (Kx, Kp)
    assert Kp % tile_k == 0

    tile_m = _pick_tile(Mp, TILE_M_CANDS)
    tile_n = _pick_tile(Np, TILE_N_CANDS)
    nk = Kp // tile_k
    use_acc = jnp.dtype(out_dtype) != jnp.dtype(jnp.float32)

    w_spec_kwargs = {}
    if nk > 2:
        # Deeper weight-stream buffering when the K reduction is long.
        w_spec_kwargs["pipeline_mode"] = pl.Buffered(3)

    out_isz = jnp.dtype(out_dtype).itemsize
    vmem_need = (2 * (tile_m * tile_k * 2 + tile_k * tile_n * 2)   # x, w double-buffered (bf16)
                 + 2 * tile_m * tile_n * out_isz                   # output double-buffered
                 + (tile_m * tile_n * 4 if use_acc else 0)         # f32 scratch accumulator
                 + 2 * tile_n * 4)                                 # bias row
    cp_kwargs = dict(dimension_semantics=("parallel", "parallel", "arbitrary"))
    if vmem_need > 12 * 1024 * 1024:
        # Only raise the scoped VMEM limit when the tile set needs it; cap at
        # v7x's 64 MiB physical VMEM.
        cp_kwargs["vmem_limit_bytes"] = int(min(2 * vmem_need, 64 * 1024 * 1024))

    return pl.pallas_call(
        functools.partial(_linear_kernel, activation=activation),
        out_shape=jax.ShapeDtypeStruct((Mp, Np), out_dtype),
        grid=(Mp // tile_m, Np // tile_n, nk),
        in_specs=[
            pl.BlockSpec((tile_m, tile_k), lambda i, j, k: (i, k)),                  # x tile
            pl.BlockSpec((tile_k, tile_n), lambda i, j, k: (k, j), **w_spec_kwargs), # weight tile
            pl.BlockSpec((1, tile_n), lambda i, j, k: (0, j)),                       # bias row
        ],
        out_specs=pl.BlockSpec((tile_m, tile_n), lambda i, j, k: (i, j)),
        scratch_shapes=([pltpu.VMEM((tile_m, tile_n), jnp.float32)] if use_acc else []),
        compiler_params=pltpu.CompilerParams(**cp_kwargs),
        cost_estimate=pl.CostEstimate(
            flops=int(2 * Mp * Np * Kp),
            transcendentals=int(Mp * Np if activation == "elu" else 0),
            bytes_accessed=int(Mp * Kp * 2 + Kp * Np * 2 + Np * 4 + Mp * Np * out_isz)),
    )(x_pad, wt, b_pad)


# ----------------------------------------------------------------------------
# Grouped per-node-type projection: one pallas_call over a leading "type" axis
# replaces len(fc_list) separate launches.
# ----------------------------------------------------------------------------
def _grouped_fc_kernel(x_ref, wt_ref, b_ref, o_ref):
    acc = jnp.dot(x_ref[...], wt_ref[...], preferred_element_type=jnp.float32)
    o_ref[...] = (acc + b_ref[...]).astype(o_ref.dtype)


def grouped_fc_pallas(x_stack, w_stack, b_stack, out_dtype=jnp.bfloat16):
    """x_stack (T, Mr, Kg) bf16, w_stack (T, Kg, Ng) bf16, b_stack (T, 1, Ng) f32
    -> (T, Mr, Ng) out_dtype."""
    T, Mr, Kg = x_stack.shape
    _, _, Ng = w_stack.shape
    out_isz = jnp.dtype(out_dtype).itemsize
    return pl.pallas_call(
        _grouped_fc_kernel,
        out_shape=jax.ShapeDtypeStruct((T, Mr, Ng), out_dtype),
        grid=(T,),
        in_specs=[
            pl.BlockSpec((None, Mr, Kg), lambda t: (t, 0, 0)),
            pl.BlockSpec((None, Kg, Ng), lambda t: (t, 0, 0)),
            pl.BlockSpec((None, 1, Ng), lambda t: (t, 0, 0)),
        ],
        out_specs=pl.BlockSpec((None, Mr, Ng), lambda t: (t, 0, 0)),
        compiler_params=pltpu.CompilerParams(dimension_semantics=("parallel",)),
        cost_estimate=pl.CostEstimate(
            flops=int(2 * T * Mr * Kg * Ng),
            transcendentals=0,
            bytes_accessed=int(T * (Mr * Kg * 2 + Kg * Ng * 2 + Ng * 4 + Mr * Ng * out_isz))),
    )(x_stack, w_stack, b_stack)


# ----------------------------------------------------------------------------
# Parameter init / packing (xavier_normal gain=1.414, like the module)
# ----------------------------------------------------------------------------
def _xavier_normal(key, shape, gain=1.414):
    fan_out, fan_in = shape
    std = gain * np.sqrt(2.0 / (fan_in + fan_out))
    return std * jax.random.normal(key, shape, dtype=jnp.float32)


def pack_linear(w, b, k_pad_to=None):
    """Pack (out, in) weight + (out,) bias once at init: transpose, pad K
    (either to the previous layer's padded width `k_pad_to`, or minimally to a
    16/256 multiple), pad N to 128, cast weight to bf16."""
    out_dim, in_dim = w.shape
    if k_pad_to is not None:
        assert k_pad_to >= in_dim and k_pad_to % 128 == 0
        Kp = k_pad_to
    else:
        Kp = _round_up(in_dim, ROW_ALIGN)
        if Kp > 512:
            Kp = _round_up(in_dim, 256)      # 256-granular padding, not 512
    tile_k = _pick_tile(Kp, TILE_K_CANDS)
    Np = _round_up(out_dim, 128)
    wt = jnp.zeros((Kp, Np), jnp.float32).at[:in_dim, :out_dim].set(
        jnp.asarray(w, jnp.float32).T).astype(jnp.bfloat16)
    b_pad = jnp.zeros((1, Np), jnp.float32).at[0, :out_dim].set(
        jnp.asarray(b, jnp.float32))
    return {"wt": wt, "b": b_pad, "n": out_dim, "k": in_dim, "tile_k": tile_k}


def init_params(key, feats_dim_list, hidden_dim, out_dim, num_heads, num_layers):
    T = len(feats_dim_list)
    Kg = _round_up(max(feats_dim_list), 128)     # uniform K across stacked types
    Ng = _round_up(hidden_dim, 128)              # padded hidden width (lane-dense)

    w_stack = jnp.zeros((T, Kg, Ng), jnp.float32)
    b_stack = jnp.zeros((T, 1, Ng), jnp.float32)
    for t, fd in enumerate(feats_dim_list):
        key, kw, kb = jax.random.split(key, 3)
        w = _xavier_normal(kw, (hidden_dim, fd))
        b = 0.01 * jax.random.normal(kb, (hidden_dim,), dtype=jnp.float32)
        w_stack = w_stack.at[t, :fd, :hidden_dim].set(w.T)
        b_stack = b_stack.at[t, 0, :hidden_dim].set(b)

    params = {
        "hidden_dim": hidden_dim, "out_dim": out_dim, "num_heads": num_heads,
        "fc_grouped": {"w_stack": w_stack.astype(jnp.bfloat16),
                       "b_stack": b_stack, "Kg": Kg, "Ng": Ng},
        "layers": [],
    }

    layer_dims = [(hidden_dim, hidden_dim)] * (num_layers - 1) + [(hidden_dim, out_dim)]
    for (in_d, out_d) in layer_dims:
        key, kw, kb = jax.random.split(key, 3)
        # layer fc weight over head-replicated features (out, in*H).
        w_full = _xavier_normal(kw, (out_d, in_d * num_heads))
        b = 0.01 * jax.random.normal(kb, (out_d,), dtype=jnp.float32)
        # Stand-in aggregation replicates features across heads, so
        # W @ tile(x, H) == (sum_h W_h) @ x: fold the head replication into
        # the weight once at init -> H x fewer FLOPs and HBM bytes.
        w_red = w_full.reshape(out_d, num_heads, in_d).sum(axis=1)
        params["layers"].append({"fc": pack_linear(w_red, b, k_pad_to=Ng)})
    return params


# ----------------------------------------------------------------------------
# Assemble per-type projections into padded node-order features (bf16).
# ----------------------------------------------------------------------------
def assemble_padded(proj_stack, counts, type_mask_np, num_nodes, rows_p):
    """proj_stack: (T, Mr, Ng).  Returns (rows_p, Ng) bf16 in node order."""
    T = len(counts)
    idx_list = [np.where(type_mask_np == t)[0] for t in range(T)]
    order = (np.concatenate(idx_list) if idx_list
             else np.array([], dtype=np.int64))
    if order.shape[0] == num_nodes and np.array_equal(order, np.arange(num_nodes)):
        h = jnp.concatenate([proj_stack[t, :counts[t], :] for t in range(T)], axis=0)
    else:
        # scatter fallback for interleaved node types
        h = jnp.zeros((num_nodes, proj_stack.shape[-1]), proj_stack.dtype)
        for t, idx in enumerate(idx_list):
            h = h.at[idx].set(proj_stack[t, :counts[t], :])
    if rows_p > num_nodes:
        h = jnp.pad(h, ((0, rows_p - num_nodes), (0, 0)))
    return h


# ----------------------------------------------------------------------------
# MAGNN_nc_ac forward
# ----------------------------------------------------------------------------
def magnn_nc_ac_forward(params, X_list, type_mask_np, target_node_indices):
    # TODO(synk): RelationalGraphConvModel (RGCN reconstruction branch) is not
    # provided; feats_opt is taken as all-zeros so the raw-feature path
    # fc_list[i](X[i].to_dense()) is used; emb_loss / recon_loss /
    # recon_feat_list are zero placeholders.
    # TODO(synk): MAGNN_ctr_ntype_specific (DGL metapath-instance attention
    # aggregation) has no clean Pallas equivalent without the graph inputs;
    # the stand-in replicates node features across heads, with the replication
    # folded into the (summed) fc weight.
    hidden_dim = params["hidden_dim"]
    out_dim = params["out_dim"]
    num_heads = params["num_heads"]
    N = int(type_mask_np.shape[0])
    T = len(X_list)
    fc = params["fc_grouped"]

    # Stack + pad per-type raw features once (bf16) and run ONE grouped kernel.
    counts = [int(Xi.shape[0]) for Xi in X_list]
    Mr = _round_up(max(counts), ROW_ALIGN)
    x_stack = jnp.zeros((T, Mr, fc["Kg"]), jnp.bfloat16)
    for t, Xi in enumerate(X_list):
        x_stack = x_stack.at[t, :counts[t], :Xi.shape[1]].set(
            jnp.asarray(Xi).astype(jnp.bfloat16))
    proj = grouped_fc_pallas(x_stack, fc["w_stack"], fc["b_stack"])  # (T, Mr, Ng) bf16

    # Node-order padded features; feat_drop is identity in eval mode.
    rows_p = _round_up(N, ROW_ALIGN)
    h_pad = assemble_padded(proj, counts, type_mask_np, N, rows_p)   # (rows_p, Ng) bf16

    # Layer chain: padded bf16 activations flow directly between pallas_calls.
    num_layers = len(params["layers"])
    for l in range(num_layers - 1):
        h_pad = linear_padded(h_pad, params["layers"][l]["fc"],
                              activation="elu", out_dtype=jnp.bfloat16)

    # Stand-in for the last layer's pre-fc attention output (head replication).
    h_last_in = h_pad[:N, :hidden_dim].astype(jnp.float32)
    logits_pad = linear_padded(h_pad, params["layers"][-1]["fc"],
                               activation=None, out_dtype=jnp.float32)
    logits = logits_pad[:N, :out_dim]
    h_last = jnp.tile(h_last_in, (1, num_heads))

    emb_loss = jnp.float32(0.0)
    recon_loss = jnp.float32(0.0)
    recon_feat_list = []
    return (logits[target_node_indices], h_last[target_node_indices],
            emb_loss, recon_loss, recon_feat_list)


# ----------------------------------------------------------------------------
if __name__ == "__main__":
    key = jax.random.PRNGKey(0)

    # Small synthetic configuration.
    feats_dim_list = [12, 20]          # two node types with different raw feature dims
    hidden_dim = 32
    out_dim = 8
    num_heads = 4
    num_layers = 2
    nodes_per_type = 8

    # Node-type mask and raw features per type (block-contiguous types).
    type_mask = np.array([0] * nodes_per_type + [1] * nodes_per_type, dtype=np.int32)
    key, k0, k1 = jax.random.split(key, 3)
    X_list = [
        jax.random.normal(k0, (nodes_per_type, feats_dim_list[0]), dtype=jnp.float32),
        jax.random.normal(k1, (nodes_per_type, feats_dim_list[1]), dtype=jnp.float32),
    ]
    target_node_indices = np.arange(4)

    key, kp = jax.random.split(key)
    params = init_params(kp, feats_dim_list, hidden_dim, out_dim, num_heads, num_layers)

    logits_t, h_t, emb_loss, recon_loss, recon_feat_list = magnn_nc_ac_forward(
        params, X_list, type_mask, target_node_indices)

    jax.block_until_ready(logits_t)
    jax.block_until_ready(h_t)

    assert logits_t.shape == (len(target_node_indices), out_dim)
    assert h_t.shape == (len(target_node_indices), hidden_dim * num_heads)
    assert bool(jnp.all(jnp.isfinite(logits_t)))
    assert bool(jnp.all(jnp.isfinite(h_t)))
    print("KERNEL_OK")
</pallas_src>

<mosaic_0001>
module attributes {stable_mosaic.version = 11 : i64} {
  func.func @_grouped_fc_kernel(%arg0: i32, %arg1: memref<1x16x128xbf16, #tpu.memory_space<vmem>>, %arg2: memref<1x128x128xbf16, #tpu.memory_space<vmem>>, %arg3: memref<1x1x128xf32, #tpu.memory_space<vmem>>, %arg4: memref<1x16x128xbf16, #tpu.memory_space<vmem>>) attributes {dimension_semantics = [#tpu.dimension_semantics<parallel>], iteration_bounds = array<i64: 2>, scalar_prefetch = 0 : i64, scratch_operands = 0 : i64, tpu.core_type = #tpu.core_type<tc>, window_params = [{transform_indices = @transform_0, window_bounds = array<i64: 1, 16, 128>}, {transform_indices = @transform_1, window_bounds = array<i64: 1, 128, 128>}, {transform_indices = @transform_2, window_bounds = array<i64: 1, 1, 128>}, {transform_indices = @transform_3, window_bounds = array<i64: 1, 16, 128>}]} {
    %c0 = arith.constant 0 : index
    %c0_0 = arith.constant 0 : index
    %c0_1 = arith.constant 0 : index
    %0 = vector.load %arg1[%c0, %c0_0, %c0_1] : memref<1x16x128xbf16, #tpu.memory_space<vmem>>, vector<1x16x128xbf16>
    %1 = vector.shape_cast %0 : vector<1x16x128xbf16> to vector<16x128xbf16>
    %c0_2 = arith.constant 0 : index
    %c0_3 = arith.constant 0 : index
    %c0_4 = arith.constant 0 : index
    %2 = vector.load %arg2[%c0_2, %c0_3, %c0_4] : memref<1x128x128xbf16, #tpu.memory_space<vmem>>, vector<1x128x128xbf16>
    %3 = vector.shape_cast %2 : vector<1x128x128xbf16> to vector<128x128xbf16>
    %cst = arith.constant dense<0.000000e+00> : vector<16x128xf32>
    %4 = tpu.matmul %1, %3, %cst {dimension_numbers = #tpu.dot_dimension_numbers<[1], [0], [0], [1], [0, 0, 1, 1], [], []>} : vector<16x128xbf16>, vector<128x128xbf16>, vector<16x128xf32> -> vector<16x128xf32>
    %c0_5 = arith.constant 0 : index
    %c0_6 = arith.constant 0 : index
    %c0_7 = arith.constant 0 : index
    %5 = vector.load %arg3[%c0_5, %c0_6, %c0_7] : memref<1x1x128xf32, #tpu.memory_space<vmem>>, vector<1x1x128xf32>
    %6 = vector.shape_cast %5 : vector<1x1x128xf32> to vector<1x128xf32>
    %7 = vector.broadcast %6 : vector<1x128xf32> to vector<16x128xf32>
    %8 = arith.addf %4, %7 : vector<16x128xf32>
    %9 = arith.truncf %8 : vector<16x128xf32> to vector<16x128xbf16>
    %c0_8 = arith.constant 0 : index
    %c0_9 = arith.constant 0 : index
    %c0_10 = arith.constant 0 : index
    %10 = vector.load %arg4[%c0_8, %c0_9, %c0_10] : memref<1x16x128xbf16, #tpu.memory_space<vmem>>, vector<1x16x128xbf16>
    %11 = vector.shape_cast %10 : vector<1x16x128xbf16> to vector<16x128xbf16>
    %12 = vector.shape_cast %9 : vector<16x128xbf16> to vector<1x16x128xbf16>
    tpu.vector_store %arg4[%c0_8, %c0_9, %c0_10], %12 {strides = array<i32>} : memref<1x16x128xbf16, #tpu.memory_space<vmem>>, vector<1x16x128xbf16>,
    return
  }
  func.func @transform_0(%arg0: i32) -> (i32, i32, i32) {
    %c0_i32 = arith.constant 0 : i32
    %c0_i32_0 = arith.constant 0 : i32
    %c0_i32_1 = arith.constant 0 : i32
    return %arg0, %c0_i32, %c0_i32_0 : i32, i32, i32
  }
  func.func @transform_1(%arg0: i32) -> (i32, i32, i32) {
    %c0_i32 = arith.constant 0 : i32
    %c0_i32_0 = arith.constant 0 : i32
    %c0_i32_1 = arith.constant 0 : i32
    return %arg0, %c0_i32, %c0_i32_0 : i32, i32, i32
  }
  func.func @transform_2(%arg0: i32) -> (i32, i32, i32) {
    %c0_i32 = arith.constant 0 : i32
    %c0_i32_0 = arith.constant 0 : i32
    %c0_i32_1 = arith.constant 0 : i32
    return %arg0, %c0_i32, %c0_i32_0 : i32, i32, i32
  }
  func.func @transform_3(%arg0: i32) -> (i32, i32, i32) {
    %c0_i32 = arith.constant 0 : i32
    %c0_i32_0 = arith.constant 0 : i32
    %c0_i32_1 = arith.constant 0 : i32
    return %arg0, %c0_i32, %c0_i32_0 : i32, i32, i32
  }
}

</mosaic_0001>

<bundles_post_ra>
// kernel: tpu_custom_call.1
= control target key start
LH: loop header
LB: loop body
LE: loop exit
PB: predicated region body
PF: predicated region fallthrough
CT: control target
= control target key end

     0   :  { %8 = vsyncpa [#allocation3], 0  ;;  %s1008_s0 = inlined_call_operand.hbm [shape: bf16[2,16,128], index: 0, kind: input, shape index: {}]   ;;  %s1009_s1 = inlined_call_operand.hbm [shape: bf16[2,128,128], index: 1, kind: input, shape index: {}]   ;;  %s1010_s2 = inlined_call_operand.vmem [shape: f32[2,1,128], index: 2, kind: input, shape index: {}]   ;;  %s1011_s3 = inlined_call_operand.hbm [shape: bf16[2,16,128], index: 3, kind: output, shape index: {}]  }
   0x1   :  { %10 = vsyncpa [#allocation3 + $0x1], 0 }
   0x2   :  { %11 = vsyncpa [#allocation6], 0 }
   0x3   :  { %13 = vsyncpa [#allocation6 + $0x1], 0 }
   0x4   :  { %14 = vsyncpa [#allocation4], 0 }
   0x5   :  { %16 = vsyncpa [#allocation4 + $0x1], 0  ;;  %s783_s12 = smov 0   ;;  %s785_s13 = smov 0  }
   0x6   :  { %s787_s14 = smov 0   ;;  %s789_s15 = smov 0  }
   0x7 LB: > { %s804_s16 = sadd.s32 4294967295, %s752_s15   ;;  %s493_s17 = sadd.s32 4294967294, %s752_s15   ;;  %s752_s15 = sphi %s789_s15, %s1027_s15   ;;  %s748_s14 = sphi %s787_s14, %s1026_s14   ;;  %s744_s13 = sphi %s785_s13, %s1025_s13   ;;  %s740_s12 = sphi %s783_s12, %s1024_s12  }
   0x8   : > { %s808_s18 = sadd.s32 1, %s752_s15   ;;  %s29_s19 = sadd.s32 1, %s748_s14 }
   0x9   : > { %s26_s20 = ssub.s32 %s752_s15, %s808_s18  ;;  %p36_p0 = scmp.ne.s32.totalorder %s748_s14, %s744_s13 }
   0xa   : > { %p27_p1 = scmp.eq.s32.totalorder %s26_s20, 0  ;;  %p37_p2 = scmp.eq.s32.totalorder %s752_s15, 0 }
   0xb   : > { %p42_p3 = scmp.ne.s32.totalorder %s744_s13, %s740_s12  ;;  %p43_p4 = scmp.eq.s32.totalorder %s804_s16, 0 }
   0xc   : > { %s820_s21 = scalar_select %p27_p1, %s748_s14, %s29_s19  }
   0xd   : > { %p822_p5 = por %p37_p2, %p36_p0  ;;  %p826_p6 = por %p43_p4, %p42_p3 }
   0xe   : > { %p118_p7 = scmp.eq.s32.totalorder %s804_s16, 1  ;;  %p124_p8 = scmp.eq.s32.totalorder %s493_s17, 1 }
   0xf   : > { %s1015_s23 = scalar_select %p826_p6, 1, 0 }
  0x10   : > { %p579_p10 = scmp.lt.s32.totalorder %s752_s15, 2  ;;  %p833_p11 = por %p118_p7, %p36_p0 }
  0x11   : > { %p837_p12 = por %p124_p8, %p42_p3  ;;  %s842_s26 = sand.u32 1, %s748_s14  }
  0x12   : > { %s1016_s24 = scalar_select %p833_p11, 1, 0 }
  0x13   : > { %s1017_s25 = scalar_select %p837_p12, 1, 0 }
  0x14   : > { %s523_s27 = sshll.u32 %s752_s15, 7  ;;  %s496_s28 = sshll.u32 %s842_s26, 3 }
  0x15   : > { %s849_s4 = scalar_lea.hbm %s1008_s0, %s523_s27  ;;  %s148_s5 = scalar_lea.vmem [#allocation2], %s496_s28 }
  0x16   : > { %s155_s6 = sshll.u32 %s148_s5, 4  ;;  %p853_p13 = pnand %p579_p10, %p822_p5  ;;  %s857_s6 = int_to_ptr.vmem [resolvable:$true] %s155_s6 }
  0x17   : > { %s145_s8 = scalar_lea.sflag [#allocation3], %s842_s26  ;;  %s628_s9 = scalar_lea.hbm %s849_s4, 128 }
  0x18   : > { %p629_p0 = scmp.ne.s32.totalorder %s849_s4, %s628_s9  ;;  %p630_p1 = pneg %p853_p13 }
  0x19   : > { %s633_s17 = scalar_lea.hbm %s1008_s0, 256  ;;  %p634_p4 = scmp.lt.s32.totalorder %s849_s4, %s1008_s0 }
  0x1a   : > { %p631_p2 = pnand %p630_p1, %p629_p0  ;;  %p635_p5 = scmp.lt.s32.totalorder %s633_s17, %s628_s9 }
  0x1c   : > { %p632_p3 = pneg %p631_p2  ;;  %p636_p7 = por %p635_p5, %p634_p4 }
  0x1e   : > { %p637_p8 = pnand %p636_p7, %p632_p3 }
  0x20   : > { %640 = shalt.err (!%p637_p8)
}
  0x21   : > { %s641_s22 = scalar_lea.vmem %s857_s6, 128  ;;  %s754_s27 = smov [#allocation2]  }
  0x22   : > { %p642_p10 = scmp.ne.s32.totalorder %s857_s6, %s641_s22  ;;  %s646_s28 = sshll.u32 %s754_s27, 4  ;;  %s647_s28 = int_to_ptr.vmem [resolvable:$false] %s646_s28 }
  0x23   : > { %s648_s29 = scalar_lea.vmem %s647_s28, 256  ;;  %p649_p9 = scmp.lt.s32.totalorder %s857_s6, %s647_s28 }
  0x24   : > { %p644_p0 = pnand %p642_p10, %p630_p1  ;;  %p650_p12 = scmp.lt.s32.totalorder %s648_s29, %s641_s22 }
  0x26   : > { %p645_p2 = pneg %p644_p0  ;;  %p651_p11 = por %p650_p12, %p649_p9 }
  0x28   : > { %p652_p4 = pnand %p651_p11, %p645_p2 }
  0x2a   : > { %655 = shalt.err (!%p652_p4)
}
  0x2b   : > { %s755_s30 = smov 64   ;;  %s756_s5 = smov 4  }
  0x2c   : > { %571 = dma.hbm_to_vmem [thread:$0]  (!%p853_p13), %s849_s4, 128, %s857_s6, %s145_s8, %s755_s30, %s755_s30, %s756_s5  }
  0x2d   : > { %p502_p9 = scmp.ge.s32.totalorder %s752_s15, 1  ;;  %p190_p11 = scmp.lt.s32.totalorder %s752_s15, 3 }
  0x2e   : > { %s499_s9 = sshll.u32 %s842_s26, 6  ;;  %s524_s11 = sshll.u32 %s752_s15, 10 }
  0x2f   : > { %p892_p12 = pnand %p502_p9, %p190_p11  ;;  %s169_s17 = scalar_lea.vmem [#allocation5], %s499_s9 }
  0x30   : > { %s176_s19 = sshll.u32 %s169_s17, 4  ;;  %s900_s27 = scalar_lea.hbm %s1009_s1, %s524_s11  ;;  %s902_s19 = int_to_ptr.vmem [resolvable:$true] %s176_s19 }
  0x31   : > { %s166_s4 = scalar_lea.sflag [#allocation6], %s842_s26  ;;  %s656_s6 = scalar_lea.hbm %s900_s27, 1024 }
  0x32   : > { %p657_p3 = scmp.ne.s32.totalorder %s900_s27, %s656_s6  ;;  %s661_s29 = scalar_lea.hbm %s1009_s1, 2048 }
  0x33   : > { %p662_p8 = scmp.lt.s32.totalorder %s900_s27, %s1009_s1  ;;  %p663_p10 = scmp.lt.s32.totalorder %s661_s29, %s656_s6 }
  0x34   : > { %p659_p5 = pnand %p657_p3, %p630_p1 }
  0x35   : > { %p664_p0 = por %p663_p10, %p662_p8 }
  0x36   : > { %p660_p7 = pneg %p659_p5 }
  0x38   : > { %p665_p2 = pnand %p664_p0, %p660_p7 }
  0x3a   : > { %668 = shalt.err (!%p665_p2)
}
  0x3b   : > { %s669_s26 = scalar_lea.vmem %s902_s19, 1024  ;;  %s757_s11 = smov [#allocation5]  }
  0x3c   : > { %p670_p4 = scmp.ne.s32.totalorder %s902_s19, %s669_s26  ;;  %s674_s20 = sshll.u32 %s757_s11, 4  ;;  %s675_s20 = int_to_ptr.vmem [resolvable:$false] %s674_s20 }
  0x3d   : > { %s676_s22 = scalar_lea.vmem %s675_s20, 2048  ;;  %p677_p3 = scmp.lt.s32.totalorder %s902_s19, %s675_s20 }
  0x3e   : > { %p672_p9 = pnand %p670_p4, %p630_p1  ;;  %p678_p5 = scmp.lt.s32.totalorder %s676_s22, %s669_s26 }
  0x40   : > { %p673_p11 = pneg %p672_p9  ;;  %p679_p6 = por %p678_p5, %p677_p3 }
  0x42   : > { %p680_p8 = pnand %p679_p6, %p673_p11 }
  0x44   : > { %683 = shalt.err (!%p680_p8)
}
  0x45   : > { %574 = dma.hbm_to_vmem [thread:$0]  (!%p853_p13), %s900_s27, 1024, %s902_s19, %s166_s4, %s755_s30, %s755_s30, %s756_s5  }
  0x46   : > { %194 = sbr.rel (%p892_p12) target bundleno = 327 (0x147), region = 32  ;;  %s933_s6 = sand.u32 (!%p892_p12), 1, %s744_s13  }
  0x47   : > { %s503_s8 = sshll.u32 (!%p892_p12), %s933_s6, 3  ;;  %s197_s28 = scalar_lea.sflag (!%p892_p12), [#allocation3], %s933_s6 }
  0x48   : > { %s939_s7 = scalar_lea.vmem (!%p892_p12), [#allocation2], %s503_s8  ;;  %p1020_p6 = scmp.ne.s32.totalorder (!%p892_p12), %s1015_s23, 0 }
  0x4b   : > { %727 = dma.done.wait (%p1020_p6), %s197_s28, 128  }
  0x4c   : > { %729 = vsyncadd (%p1020_p6), %s197_s28, 4294967168  ;;  %s504_s30 = sshll.u32 %s933_s6, 6  ;;  %s206_s5 = scalar_lea.sflag [#allocation6], %s933_s6 }
  0x4d   : > { %s209_s10 = scalar_lea.vmem [#allocation5], %s504_s30 }
  0x4e   : > { %731 = dma.done.wait (%p1020_p6), %s206_s5, 1024  }
  0x4f   : > { %733 = vsyncadd (%p1020_p6), %s206_s5, 4294966272  ;;  %v758_v0 = vmov 0.0   ;;  %vm759_vm0 = vmmov 0   ;;  %v619_v1 = vld [vmem:[%s209_s10 + $0x38] sm:$0xff]   ;;  %v620_v2 = vld [vmem:[%s209_s10 + $0x30] sm:$0xff]   ;;  %p240_p13 = scmp.lt.s32.totalorder %s804_s16, 1 }
  0x50   : > { %542 = vmatprep.subr.bf16.mxu0 %v758_v0  ;;  %558 = vmatprep.mubr.msk.bf16.mxu0 %vm759_vm0, %v758_v0  ;;  %v621_v3 = vld [vmem:[%s209_s10 + $0x28] sm:$0xff]   ;;  %v622_v4 = vld [vmem:[%s209_s10 + $0x20] sm:$0xff]   ;;  %v623_v5 = vld [vmem:[%s209_s10 + $0x18] sm:$0xff]   ;;  %s239_s29 = scalar_lea.vmem [#allocation7], %s503_s8  ;;  %s527_s17 = sshll.u32 %s804_s16, 7 }
  0x51   : > { %543 = vmatpush3.bf16.msra.mxu0 %v619_v1  ;;  %v624_v6 = vld [vmem:[%s209_s10 + $0x10] sm:$0xff]   ;;  %v625_v7 = vld [vmem:[%s209_s10 + $0x8] sm:$0xff]   ;;  %v626_v8 = vld [vmem:[%s209_s10] sm:$0xff]   ;;  %s241_s23 = scalar_select %p240_p13, %s804_s16, 1 }
  0x52   : > { %544 = vmatprep.subr.bf16.mxu0 %v758_v0  ;;  %v627_v9 = vld [vmem:[%s939_s7] sm:$0xff]   ;;  %s388_s9 = sshll.u32 %s239_s29, 4  ;;  %s965_s20 = scalar_lea.hbm %s1011_s3, %s527_s17  ;;  %s960_s9 = int_to_ptr.vmem [resolvable:$true] %s388_s9 }
  0x53   : > { %s242_s4 = scalar_lea.vmem %s1010_s2, %s241_s23  ;;  %s375_s22 = scalar_lea.sflag [#allocation4], %s933_s6 }
  0x54   : > { %v506_v11 = vld [vmem:[%s242_s4] ss:$0 sm:$0xff]  ;;  %s684_s8 = scalar_lea.vmem %s960_s9, 128  ;;  %p1021_p12 = scmp.ne.s32.totalorder %s1016_s24, 0 }
  0x55   : > { %545 = vmatpush3.bf16.msra.mxu0 %v620_v2  ;;  %p685_p1 = scmp.ne.s32.totalorder %s960_s9, %s684_s8  ;;  %s760_s16 = smov [#allocation7]  }
  0x56   : > { %546 = vmatprep.subr.bf16.mxu0 %v758_v0  ;;  %s688_s28 = sshll.u32 %s760_s16, 4  ;;  %s689_s28 = int_to_ptr.vmem [resolvable:$false] %s688_s28 }
  0x57   : > { %p686_p7 = pnand %p685_p1, %p1021_p12  ;;  %s690_s7 = scalar_lea.vmem %s689_s28, 256 }
  0x58   : > { %p691_p0 = scmp.lt.s32.totalorder %s960_s9, %s689_s28  ;;  %p692_p2 = scmp.lt.s32.totalorder %s690_s7, %s684_s8 }
  0x59   : > { %547 = vmatpush3.bf16.msra.mxu0 %v621_v3  ;;  %p687_p10 = pneg %p686_p7 }
  0x5a   : > { %548 = vmatprep.subr.bf16.mxu0 %v758_v0  ;;  %p693_p4 = por %p692_p2, %p691_p0 }
  0x5c   : > { %p694_p9 = pnand %p693_p4, %p687_p10 }
  0x5d   : > { %549 = vmatpush3.bf16.msra.mxu0 %v622_v4 }
  0x5e   : > { %550 = vmatprep.subr.bf16.mxu0 %v758_v0 }
  0x61   : > { %551 = vmatpush3.bf16.msra.mxu0 %v623_v5 }
  0x62   : > { %552 = vmatprep.subr.bf16.mxu0 %v758_v0 }
  0x65   : > { %553 = vmatpush3.bf16.msra.mxu0 %v624_v6 }
  0x66   : > { %554 = vmatprep.subr.bf16.mxu0 %v758_v0 }
  0x69   : > { %555 = vmatpush3.bf16.msra.mxu0 %v625_v7 }
  0x6a   : > { %556 = vmatprep.subr.bf16.mxu0 %v758_v0 }
  0x6d   : > { %557 = vmatpush3.bf16.msra.mxu0 %v626_v8 }
  0x70   : > { %559 = vmatmul.mubr.bf16.vlgmr.msra.gmra.mxu0 %v627_v9 }
 0x130   : > { %v357_v10 = vpop.f32.mrf.mxu0 }
 0x131   : > { %v358_v14 = vadd.f32 %v506_v11, %v357_v10 }
 0x132   : > { %v560_v12 = vpop.f32.mrf.mxu0 }
 0x134   : > { %v360_v13 = vpop.f32.mrf.mxu0 }
 0x135   : > { %v361_v15 = vadd.f32 %v506_v11, %v360_v13 }
 0x136   : > { %v561_v16 = vpop.f32.mrf.mxu0 }
 0x137   : > { %v531_v17 = vpack.c.bf16 %v361_v15, %v358_v14 }
 0x139   : > { %532 = vst [vmem:[%s239_s29] sm:$0xff] %v531_v17  }
 0x13a   : > { %697 = shalt.err (!%p694_p9)
}
 0x13b   : > { %s698_s30 = scalar_lea.hbm %s965_s20, 128  ;;  %s702_s23 = scalar_lea.hbm %s1011_s3, 256 }
 0x13c   : > { %p699_p11 = scmp.ne.s32.totalorder %s965_s20, %s698_s30  ;;  %p703_p8 = scmp.lt.s32.totalorder %s965_s20, %s1011_s3 }
 0x13d   : > { %p704_p6 = scmp.lt.s32.totalorder %s702_s23, %s698_s30 }
 0x13e   : > { %p700_p3 = pnand %p699_p11, %p1021_p12 }
 0x13f   : > { %p705_p13 = por %p704_p6, %p703_p8 }
 0x140   : > { %p701_p5 = pneg %p700_p3 }
 0x142   : > { %p706_p1 = pnand %p705_p13, %p701_p5 }
 0x144   : > { %709 = shalt.err (!%p706_p1)
}
 0x145   : > { %s761_s4 = smov 64   ;;  %s762_s29 = smov 4  }
 0x146   : > { %566 = dma.vmem_to_hbm [thread:$0]  (%p1021_p12), %s960_s9, 128, %s965_s20, %s375_s22, %s761_s4, %s761_s4, %s762_s29  }
 0x147 PF: > { %s403_s17 = sand.u32 1, %s740_s12   ;;  %p1022_p7 = scmp.ne.s32.totalorder %s1017_s25, 0 }
 0x148   : > { %p1023_p10 = scmp.ge.s32.totalorder %s752_s15, 2  ;;  %s404_s26 = scalar_lea.sflag [#allocation4], %s403_s17 }
 0x14a   : > { %p576_p0 = pnand %p1023_p10, %p1022_p7 }
 0x14c   : > { %p577_p2 = pneg %p576_p0 }
 0x14e   : > { %735 = dma.done.wait (%p577_p2), %s404_s26, 128  }
 0x14f   : > { %737 = vsyncadd (%p577_p2), %s404_s26, 4294967168  ;;  %p19_p4 = scmp.ge.s32.totalorder %s808_s18, 4   ;;  %s1024_s12 = smov %s744_s13 }
 0x150   : > { %s1025_s13 = smov %s748_s14  ;;  %s1026_s14 = smov %s820_s21 }
 0x151   : > { %s1027_s15 = smov %s808_s18  ;;  %21 = sbr.rel (!%p19_p4) target bundleno = 7 (0x7), region = 93 }
 0x156   :  { %409 = vsyncpa [#allocation3], 1 }
 0x157   :  { %411 = vsyncpa [#allocation3 + $0x1], 1 }
 0x158   :  { %412 = vsyncpa [#allocation6], 1 }
 0x159   :  { %414 = vsyncpa [#allocation6 + $0x1], 1 }
 0x15a   :  { %415 = vsyncpa [#allocation4], 1 }
 0x15b   :  { %417 = vsyncpa [#allocation4 + $0x1], 1 }

</bundles_post_ra>
